<compile_context>
chip_gen: v7x
topology: tpu7x:2x2x1
jax: 0.10.0
libtpu: 0.0.40
codegen_flags: <defaults>
</compile_context>

<pallas_src>
import functools

import jax
import jax.numpy as jnp
from jax import lax
from jax.experimental import pallas as pl
from jax.experimental.pallas import tpu as pltpu

LANE = 128
MAX_ROW_TILE = 4096            # 4096 x 128 f32 = 2 MiB per input tile
SMALL_FASTPATH_ELEMS = 1 << 18  # below this, plain jnp beats kernel fixed costs
VMEM_LIMIT_BYTES = 32 * 1024 * 1024


def _cdiv(a, b):
    return (a + b - 1) // b


def _num_tensorcores():
    """TensorCores per chip: 2 on v7x, 1 on v5e/v6e (and anything unknown)."""
    try:
        dev = jax.devices()[0]
        if dev.platform != "tpu":
            return 1
        kind = str(getattr(dev, "device_kind", "")).lower()
        if "v7" in kind or "7x" in kind:
            return 2
    except Exception:
        pass
    return 1


def _pinball_jnp(predictions, targets, quantile):
    """Small-input / remainder fallback (pure VPU-style jnp, fused by XLA)."""
    err = targets.astype(jnp.float32) - predictions.astype(jnp.float32)
    return jnp.mean(err * jnp.where(err >= 0.0, quantile, quantile - 1.0))


def _pinball_kernel(pred_ref, tgt_ref, out_ref, acc_ref, *,
                    quantile, total_rows, row_tile, tiles_per_shard, needs_mask):
    j = pl.program_id(1)

    @pl.when(j == 0)
    def _init():
        acc_ref[...] = jnp.zeros_like(acc_ref)

    err = tgt_ref[...].astype(jnp.float32) - pred_ref[...].astype(jnp.float32)
    # One mul + select instead of two muls + max (same result).
    loss = err * jnp.where(err >= 0.0, quantile, quantile - 1.0)

    if needs_mask:
        # Zero out rows past the true end of the array (garbage from the
        # padded / duplicated last block).  Trace-time gated: aligned inputs
        # pay nothing.
        i = pl.program_id(0)
        row_start = (i * tiles_per_shard + j) * row_tile
        row_ids = lax.broadcasted_iota(jnp.int32, loss.shape, 0)
        loss = jnp.where(row_start + row_ids < total_rows, loss, 0.0)

    # Fold the (row_tile, 128) tile into the tiny (8, 128) accumulator with
    # pure cross-vreg VPU adds; cross-lane/sublane reduce deferred to epilogue.
    acc_ref[...] += loss.reshape(row_tile // 8, 8, LANE).sum(axis=0)

    @pl.when(j == pl.num_programs(1) - 1)
    def _finalize():
        out_ref[...] = jnp.sum(acc_ref[...], keepdims=True)


def pinball_loss(predictions, targets, quantile=0.8, *, use_pallas=None):
    assert predictions.shape == targets.shape, "shape mismatch"
    total = predictions.size
    assert total > 0, "empty input"
    q = float(quantile)

    rows = total // LANE               # number of full 128-element lanes
    if use_pallas is None:
        use_pallas = total >= SMALL_FASTPATH_ELEMS

    # Dtype-aware row alignment: 8 for 4-byte, 16 for 2-byte, 32 for 1-byte.
    itemsize = jnp.dtype(predictions.dtype).itemsize
    row_align = max(8, 32 // max(1, itemsize))

    if (not use_pallas) or rows < row_align:
        # Too small for the kernel to pay off (or to tile at all).
        return _pinball_jnp(predictions, targets, q)

    p_flat = predictions.reshape(-1)
    t_flat = targets.reshape(-1)
    main = rows * LANE
    tail = total - main

    # Sub-128-element remainder handled with plain jnp (no padded copies).
    tail_sum = jnp.zeros((), jnp.float32)
    if tail:
        te = t_flat[main:].astype(jnp.float32) - p_flat[main:].astype(jnp.float32)
        tail_sum = jnp.sum(te * jnp.where(te >= 0.0, q, q - 1.0))
        p_main, t_main = p_flat[:main], t_flat[:main]
    else:
        p_main, t_main = p_flat, t_flat

    p2d = p_main.reshape(rows, LANE)
    t2d = t_main.reshape(rows, LANE)

    # --- Tiling ------------------------------------------------------------
    num_shards = _num_tensorcores()
    per_shard_rows = _cdiv(rows, num_shards)
    row_tile = min(MAX_ROW_TILE,
                   max(row_align, (per_shard_rows // row_align) * row_align))
    # row_tile <= rows is guaranteed (rows >= row_align), so no block exceeds
    # the array; at most the last block partially overhangs (masked in-kernel).
    n_blocks = _cdiv(rows, row_tile)
    tiles_per_shard = _cdiv(n_blocks, num_shards)
    needs_mask = (n_blocks * row_tile != rows) or \
                 (num_shards * tiles_per_shard != n_blocks)

    def in_map(i, j):
        b = i * tiles_per_shard + j
        # Clamp so a shard's trailing (empty) block never goes fully OOB; its
        # contribution is zeroed by the in-kernel row mask.
        return (jnp.minimum(b, n_blocks - 1), 0)

    kernel = functools.partial(
        _pinball_kernel,
        quantile=q,
        total_rows=rows,
        row_tile=row_tile,
        tiles_per_shard=tiles_per_shard,
        needs_mask=needs_mask,
    )

    partials = pl.pallas_call(
        kernel,
        out_shape=jax.ShapeDtypeStruct((num_shards, 1), jnp.float32),
        grid_spec=pltpu.PrefetchScalarGridSpec(
            num_scalar_prefetch=0,
            grid=(num_shards, tiles_per_shard),
            in_specs=[
                pl.BlockSpec((row_tile, LANE), in_map),
                pl.BlockSpec((row_tile, LANE), in_map),
            ],
            out_specs=pl.BlockSpec((1, 1), lambda i, j: (i, 0)),
            scratch_shapes=[pltpu.VMEM((8, LANE), jnp.float32)],
        ),
        compiler_params=pltpu.CompilerParams(
            dimension_semantics=("parallel", "arbitrary"),
            vmem_limit_bytes=VMEM_LIMIT_BYTES,
        ),
    )(p2d, t2d)

    return (jnp.sum(partials) + tail_sum) / float(total)


if __name__ == "__main__":
    key = jax.random.PRNGKey(0)
    k1, k2, k3, k4, k5, k6 = jax.random.split(key, 6)
    q = 0.8

    def ref_loss(p, t):
        e = t - p
        return jnp.mean(jnp.maximum(q * e, (q - 1.0) * e))

    # (1) Shape consistent with the module's usage; forced through the kernel.
    p1 = jax.random.normal(k1, (2, 4, 16, 16), dtype=jnp.float32)
    t1 = jax.random.normal(k2, (2, 4, 16, 16), dtype=jnp.float32)
    l1 = jax.block_until_ready(pinball_loss(p1, t1, quantile=q, use_pallas=True))
    r1 = ref_loss(p1, t1)
    assert jnp.allclose(l1, r1, atol=1e-5, rtol=1e-5), (l1, r1)

    # (2) Non-128-aligned size -> exercises in-kernel tail-row masking plus the
    #     jnp remainder path (no padded copies anywhere).
    p2 = jax.random.normal(k3, (5, 7, 97), dtype=jnp.float32)
    t2 = jax.random.normal(k4, (5, 7, 97), dtype=jnp.float32)
    l2 = jax.block_until_ready(pinball_loss(p2, t2, quantile=q, use_pallas=True))
    r2 = ref_loss(p2, t2)
    assert jnp.allclose(l2, r2, atol=1e-5, rtol=1e-5), (l2, r2)

    # (3) Tiny input -> automatic small-input fast path (plain jnp).
    p3 = jax.random.normal(k5, (3, 5, 7), dtype=jnp.float32)
    t3 = jax.random.normal(k6, (3, 5, 7), dtype=jnp.float32)
    l3 = jax.block_until_ready(pinball_loss(p3, t3, quantile=q))
    r3 = ref_loss(p3, t3)
    assert jnp.allclose(l3, r3, atol=1e-5, rtol=1e-5), (l3, r3)

    print("KERNEL_OK")
</pallas_src>

<mosaic_0001>
module attributes {stable_mosaic.version = 11 : i64} {
  func.func @_pinball_kernel(%arg0: i32, %arg1: i32, %arg2: memref<16x128xf32, #tpu.memory_space<vmem>>, %arg3: memref<16x128xf32, #tpu.memory_space<vmem>>, %arg4: memref<1x1xf32, #tpu.memory_space<vmem>>, %arg5: memref<8x128xf32, #tpu.memory_space<vmem>>) attributes {dimension_semantics = [#tpu.dimension_semantics<parallel>, #tpu.dimension_semantics<arbitrary>], iteration_bounds = array<i64: 1, 1>, scalar_prefetch = 0 : i64, scratch_operands = 1 : i64, tpu.core_type = #tpu.core_type<tc>, window_params = [{transform_indices = @transform_0, window_bounds = array<i64: 16, 128>}, {transform_indices = @transform_1, window_bounds = array<i64: 16, 128>}, {transform_indices = @transform_2, window_bounds = array<i64: 1, 1>}]} {
    %c0_i32 = arith.constant 0 : i32
    %0 = arith.cmpi eq, %arg1, %c0_i32 : i32
    %1 = arith.extui %0 : i1 to i32
    %c0_i32_0 = arith.constant 0 : i32
    %2 = arith.cmpi ne, %1, %c0_i32_0 : i32
    scf.if %2 {
      %cst_13 = arith.constant 0.000000e+00 : f32
      %20 = vector.broadcast %cst_13 : f32 to vector<8x128xf32>
      %c0_14 = arith.constant 0 : index
      %c0_15 = arith.constant 0 : index
      %21 = vector.load %arg5[%c0_14, %c0_15] : memref<8x128xf32, #tpu.memory_space<vmem>>, vector<8x128xf32>
      tpu.vector_store %arg5[%c0_14, %c0_15], %20 {strides = array<i32>} : memref<8x128xf32, #tpu.memory_space<vmem>>, vector<8x128xf32>,
    } else {
    }
    %c0 = arith.constant 0 : index
    %c0_1 = arith.constant 0 : index
    %3 = vector.load %arg3[%c0, %c0_1] : memref<16x128xf32, #tpu.memory_space<vmem>>, vector<16x128xf32>
    %c0_2 = arith.constant 0 : index
    %c0_3 = arith.constant 0 : index
    %4 = vector.load %arg2[%c0_2, %c0_3] : memref<16x128xf32, #tpu.memory_space<vmem>>, vector<16x128xf32>
    %5 = arith.subf %3, %4 : vector<16x128xf32>
    %cst = arith.constant 0.000000e+00 : f32
    %6 = vector.broadcast %cst : f32 to vector<16x128xf32>
    %7 = arith.cmpf oge, %5, %6 : vector<16x128xf32>
    %cst_4 = arith.constant 8.000000e-01 : f32
    %cst_5 = arith.constant -2.000000e-01 : f32
    %8 = vector.broadcast %cst_4 : f32 to vector<16x128xf32>
    %9 = vector.broadcast %cst_5 : f32 to vector<16x128xf32>
    %10 = arith.select %7, %8, %9 : vector<16x128xi1>, vector<16x128xf32>
    %11 = arith.mulf %5, %10 : vector<16x128xf32>
    %c0_6 = arith.constant 0 : index
    %c0_7 = arith.constant 0 : index
    %12 = vector.load %arg5[%c0_6, %c0_7] : memref<8x128xf32, #tpu.memory_space<vmem>>, vector<8x128xf32>
    %13 = vector.shape_cast %11 : vector<16x128xf32> to vector<2x8x128xf32>
    %cst_8 = arith.constant dense<0.000000e+00> : vector<8x128xf32>
    %14 = vector.multi_reduction <add>, %13, %cst_8 [0] : vector<2x8x128xf32> to vector<8x128xf32>
    %15 = arith.addf %12, %14 : vector<8x128xf32>
    %c0_9 = arith.constant 0 : index
    %c0_10 = arith.constant 0 : index
    %16 = vector.load %arg5[%c0_9, %c0_10] : memref<8x128xf32, #tpu.memory_space<vmem>>, vector<8x128xf32>
    tpu.vector_store %arg5[%c0_9, %c0_10], %15 {strides = array<i32>} : memref<8x128xf32, #tpu.memory_space<vmem>>, vector<8x128xf32>,
    %c0_i32_11 = arith.constant 0 : i32
    %17 = arith.cmpi eq, %arg1, %c0_i32_11 : i32
    %18 = arith.extui %17 : i1 to i32
    %c0_i32_12 = arith.constant 0 : i32
    %19 = arith.cmpi ne, %18, %c0_i32_12 : i32
    scf.if %19 {
      %c0_13 = arith.constant 0 : index
      %c0_14 = arith.constant 0 : index
      %20 = vector.load %arg5[%c0_13, %c0_14] : memref<8x128xf32, #tpu.memory_space<vmem>>, vector<8x128xf32>
      %21 = vector.shape_cast %20 : vector<8x128xf32> to vector<1x8x128xf32>
      %cst_15 = arith.constant dense<0.000000e+00> : vector<1xf32>
      %22 = vector.multi_reduction <add>, %21, %cst_15 [1, 2] : vector<1x8x128xf32> to vector<1xf32>
      %23 = vector.shape_cast %22 : vector<1xf32> to vector<1x1x1xf32>
      %24 = vector.extract %23[0, 0, 0] : f32 from vector<1x1x1xf32>
      %25 = vector.broadcast %24 : f32 to vector<1x1xf32>
      %c0_16 = arith.constant 0 : index
      %c0_17 = arith.constant 0 : index
      %26 = vector.load %arg4[%c0_16, %c0_17] : memref<1x1xf32, #tpu.memory_space<vmem>>, vector<1x1xf32>
      tpu.vector_store %arg4[%c0_16, %c0_17], %25 {strides = array<i32>} : memref<1x1xf32, #tpu.memory_space<vmem>>, vector<1x1xf32>,
    } else {
    }
    return
  }
  func.func @transform_0(%arg0: i32, %arg1: i32) -> (i32, i32) {
    %c1_i32 = arith.constant 1 : i32
    %0 = arith.muli %arg0, %c1_i32 : i32
    %1 = arith.addi %0, %arg1 : i32
    %c0_i32 = arith.constant 0 : i32
    %2 = arith.minsi %1, %c0_i32 : i32
    %c0_i32_0 = arith.constant 0 : i32
    %c0_i32_1 = arith.constant 0 : i32
    return %2, %c0_i32_0 : i32, i32
  }
  func.func @transform_1(%arg0: i32, %arg1: i32) -> (i32, i32) {
    %c1_i32 = arith.constant 1 : i32
    %0 = arith.muli %arg0, %c1_i32 : i32
    %1 = arith.addi %0, %arg1 : i32
    %c0_i32 = arith.constant 0 : i32
    %2 = arith.minsi %1, %c0_i32 : i32
    %c0_i32_0 = arith.constant 0 : i32
    %c0_i32_1 = arith.constant 0 : i32
    return %2, %c0_i32_0 : i32, i32
  }
  func.func @transform_2(%arg0: i32, %arg1: i32) -> (i32, i32) {
    %c0_i32 = arith.constant 0 : i32
    %c0_i32_0 = arith.constant 0 : i32
    return %arg0, %c0_i32 : i32, i32
  }
}

</mosaic_0001>

<bundles_post_ra>
// kernel: tpu_custom_call.1
= control target key start
LH: loop header
LB: loop body
LE: loop exit
PB: predicated region body
PF: predicated region fallthrough
CT: control target
= control target key end

     0   :  { %7 = vsyncpa [#allocation4], 0  ;;  %s254_s0 = inlined_call_operand.hbm [shape: f32[16,128], index: 0, kind: input, shape index: {}]   ;;  %s255_s1 = inlined_call_operand.hbm [shape: f32[16,128], index: 1, kind: input, shape index: {}]   ;;  %s256_s2 = inlined_call_operand.hbm [shape: f32[1,1], index: 2, kind: output, shape index: {}]  }
   0x1   :  { %8 = vsyncpa [#allocation7], 0 }
   0x2   :  { %9 = vsyncpa [#allocation5], 0  ;;  %s197_s9 = smov [#allocation3]   ;;  %s125_s13 = scalar_lea.hbm %s254_s0, 256 }
   0x3   :  { %s21_s10 = sshll.u32 %s197_s9, 4  ;;  %p126_p0 = scmp.ne.s32.totalorder %s254_s0, %s125_s13  ;;  %s22_s10 = int_to_ptr.vmem [resolvable:$true] %s21_s10 }
   0x4   :  { %p129_p1 = scmp.lt.u32.totalorder %s125_s13, %s254_s0 }
   0x6   :  { %p131_p2 = pnand %p129_p1, %p126_p0 }
   0x8   :  { %134 = shalt.err (!%p131_p2)
}
   0x9   :  { %s135_s18 = scalar_lea.vmem %s22_s10, 256  ;;  %p140_p4 = scmp.lt.s32.totalorder %s22_s10, %s22_s10 }
   0xa   :  { %p136_p3 = scmp.ne.s32.totalorder %s22_s10, %s135_s18  ;;  %p141_p5 = scmp.lt.s32.totalorder %s135_s18, %s135_s18 }
   0xc   :  { %p142_p6 = por %p141_p5, %p140_p4 }
   0xe   :  { %p143_p7 = pnand %p142_p6, %p136_p3 }
  0x10   :  { %146 = shalt.err (!%p143_p7)
}
  0x11   :  { %s198_s19 = smov 128   ;;  %s199_s20 = smov 8  }
  0x12   :  { %27 = dma.hbm_to_vmem [thread:$0]  %s254_s0, 256, %s22_s10, [#allocation4], %s198_s19, %s198_s19, %s199_s20  }
  0x13   :  { %s200_s23 = smov [#allocation6]   ;;  %s147_s27 = scalar_lea.hbm %s255_s1, 256 }
  0x14   :  { %s39_s24 = sshll.u32 %s200_s23, 4  ;;  %p148_p8 = scmp.ne.s32.totalorder %s255_s1, %s147_s27  ;;  %s40_s24 = int_to_ptr.vmem [resolvable:$true] %s39_s24 }
  0x15   :  { %p151_p9 = scmp.lt.u32.totalorder %s147_s27, %s255_s1 }
  0x17   :  { %p153_p10 = pnand %p151_p9, %p148_p8 }
  0x19   :  { %156 = shalt.err (!%p153_p10)
}
  0x1a   :  { %s157_s4 = scalar_lea.vmem %s40_s24, 256  ;;  %p162_p12 = scmp.lt.s32.totalorder %s40_s24, %s40_s24 }
  0x1b   :  { %p158_p11 = scmp.ne.s32.totalorder %s40_s24, %s157_s4  ;;  %p163_p13 = scmp.lt.s32.totalorder %s157_s4, %s157_s4 }
  0x1d   :  { %p164_p0 = por %p163_p13, %p162_p12 }
  0x1f   :  { %p165_p1 = pnand %p164_p0, %p158_p11 }
  0x21   :  { %168 = shalt.err (!%p165_p1)
}
  0x22   :  { %45 = dma.hbm_to_vmem [thread:$0]  %s255_s1, 256, %s40_s24, [#allocation7], %s198_s19, %s198_s19, %s199_s20  }
  0x23   :  { %191 = dma.done.wait [#allocation4], 256  }
  0x24   :  { %192 = vsyncadd [#allocation4], 4294967040 }
  0x25   :  { %193 = dma.done.wait [#allocation7], 256  }
  0x26   :  { %194 = vsyncadd [#allocation7], 4294967040  ;;  %v65_v0 = vld [vmem:[#allocation6] sm:$0xff]  ;;  %v66_v1 = vld [vmem:[#allocation6 + $0x8] sm:$0xff]  ;;  %v201_v6 = vmov -0.2  }
  0x27   :  { %v67_v2 = vld [vmem:[#allocation3] sm:$0xff]  ;;  %v68_v3 = vld [vmem:[#allocation3 + $0x8] sm:$0xff]  ;;  %s202_s1 = smov [#allocation8]   ;;  %vm95_vm2 = vcmask 0  }
  0x28   :  { %v69_v4 = vsub.f32 %v65_v0, %v67_v2  ;;  %v70_v5 = vsub.f32 %v66_v1, %v68_v3  ;;  %s103_s6 = sshll.u32 %s202_s1, 4  ;;  %s104_s6 = int_to_ptr.vmem [resolvable:$true] %s103_s6 }
  0x29   :  { %s169_s8 = scalar_lea.vmem %s104_s6, 16  ;;  %s173_s9 = scalar_lea.vmem %s104_s6, 32 }
  0x2a   :  { %vm71_vm0 = vcmp.ge.f32.partialorder %v69_v4, 0.0  ;;  %vm72_vm1 = vcmp.ge.f32.partialorder %v70_v5, 0.0  ;;  %p170_p2 = scmp.ne.s32.totalorder %s104_s6, %s169_s8  ;;  %p174_p3 = scmp.lt.s32.totalorder %s104_s6, %s104_s6 }
  0x2b   :  { %v73_v7 = vsel %vm71_vm0, 0.8, %v201_v6  ;;  %v74_v8 = vsel %vm72_vm1, 0.8, %v201_v6  ;;  %p175_p4 = scmp.lt.s32.totalorder %s173_s9, %s169_s8 }
  0x2c   :  { %v75_v9 = vmul.f32 %v73_v7, %v69_v4  ;;  %v76_v10 = vmul.f32 %v74_v8, %v70_v5 }
  0x2d   :  { %p176_p5 = por %p175_p4, %p174_p3 }
  0x2e   :  { %v78_v11 = vadd.f32 %v76_v10, %v75_v9 }
  0x2f   :  { %p177_p6 = pnand %p176_p5, %p170_p2 }
  0x30   :  { %85 = vadd.xlane.f32.xlu0 %v78_v11 }
  0xbd   :  { %v86_v12 = vpop.xlane.xlu0 %85 }
  0xbe   :  { %v87_v13 = vrot.slane %v86_v12, 4 }
  0xc0   :  { %v88_v14 = vadd.f32 %v87_v13, %v86_v12 }
  0xc2   :  { %v89_v15 = vrot.slane %v88_v14, 2 }
  0xc4   :  { %v90_v16 = vadd.f32 %v89_v15, %v88_v14 }
  0xc6   :  { %v91_v17 = vrot.slane %v90_v16, 1 }
  0xc8   :  { %v92_v18 = vadd.f32 %v91_v17, %v90_v16 }
  0xca   :  { %117 = vpush %v92_v18 }
  0xfb   :  { %s118_s7 = spop %117 }
  0xfc   :  { %v94_v19 = vstv %s118_s7 }
  0xfd   :  { %96 = vst.msk [vmem:[#allocation8] sm:$0x1] %vm95_vm2, %v94_v19 }
  0xfe   :  { %180 = shalt.err (!%p177_p6)
}
  0xff   :  { %s181_s12 = scalar_lea.hbm %s256_s2, 16 }
 0x100   :  { %p182_p7 = scmp.ne.s32.totalorder %s256_s2, %s181_s12  ;;  %p185_p8 = scmp.lt.u32.totalorder %s181_s12, %s256_s2 }
 0x102   :  { %p187_p9 = pnand %p185_p8, %p182_p7 }
 0x104   :  { %190 = shalt.err (!%p187_p9)
}
 0x105   :  { %106 = dma.vmem_to_hbm [thread:$0]  %s104_s6, 16, %s256_s2, [#allocation5]  }
 0x106   :  { %195 = dma.done.wait [#allocation5], 16  }
 0x107   :  { %196 = vsyncadd [#allocation5], 4294967280 }
 0x108   :  { %110 = vsyncpa [#allocation4], 1 }
 0x109   :  { %111 = vsyncpa [#allocation7], 1 }
 0x10a   :  { %112 = vsyncpa [#allocation5], 1 }

</bundles_post_ra>
